<compile_context>
chip_gen: v7x
topology: tpu7x:2x2x1
jax: 0.10.0
libtpu: 0.0.40
codegen_flags: <defaults>
</compile_context>

<pallas_src>
import functools

import jax
import jax.numpy as jnp
from jax.experimental import pallas as pl
from jax.experimental.pallas import tpu as pltpu


LANE = 128

_CP_1D = pltpu.CompilerParams(
    dimension_semantics=("parallel",),
    vmem_limit_bytes=32 * 1024 * 1024,
)
_CP_2D = pltpu.CompilerParams(
    dimension_semantics=("parallel", "arbitrary"),
    vmem_limit_bytes=32 * 1024 * 1024,
)


def _round_up(x, m):
    return ((x + m - 1) // m) * m


def _pick_tile(n_pad, pref):
    t = max(LANE, min(pref, n_pad))
    t = (t // LANE) * LANE
    while n_pad % t != 0:
        t -= LANE
    return t


def _pad2(x, rows, cols, dtype):
    out = jnp.zeros((rows, cols), dtype)
    return out.at[: x.shape[0], : x.shape[1]].set(x.astype(dtype))


# ----------------------------------------------------------------------------
# Kernels
# ----------------------------------------------------------------------------
def sage_project_kernel(x_ref, w_ref, z_ref, r_ref):
    # [z | r] = x @ [wl | wr]  -- one fused MXU matmul (K = F_pad).
    zr = jnp.dot(x_ref[...], w_ref[...], preferred_element_type=jnp.float32)
    hp = z_ref.shape[1]
    z_ref[...] = zr[:, :hp].astype(z_ref.dtype)
    r_ref[...] = zr[:, hp:].astype(r_ref.dtype)


def sage_aggregate_kernel(a_ref, z_ref, r_ref, b_ref, h_ref, acc_ref):
    # h = relu(l2_normalize(A_rows @ z + r + b)); K axis streams A's columns.
    k = pl.program_id(1)

    @pl.when(k == 0)
    def _init():
        acc_ref[...] = jnp.zeros_like(acc_ref)

    acc_ref[...] += jnp.dot(a_ref[...], z_ref[...],
                            preferred_element_type=jnp.float32)

    @pl.when(k == pl.num_programs(1) - 1)
    def _finalize():
        h = acc_ref[...] + r_ref[...].astype(jnp.float32) + b_ref[...]
        sumsq = jnp.sum(h * h, axis=1, keepdims=True)
        # F.normalize(p=2, dim=1): h / max(||h||, 1e-12) == h * rsqrt(max(ss, 1e-24))
        h = h * jax.lax.rsqrt(jnp.maximum(sumsq, 1e-24))
        h_ref[...] = jnp.maximum(h, 0.0).astype(h_ref.dtype)


def final_linear_kernel(h1_ref, h2_ref, h3_ref, w_ref, b_ref, out_ref):
    # lin(cat([h1,h2,h3], dim=1)) as a single K = 3*H_pad matmul.
    cat = jnp.concatenate([h1_ref[...], h2_ref[...], h3_ref[...]], axis=1)
    out_ref[...] = (jnp.dot(cat, w_ref[...], preferred_element_type=jnp.float32)
                    + b_ref[...]).astype(out_ref.dtype)


# ----------------------------------------------------------------------------
# pallas_call wrappers
# ----------------------------------------------------------------------------
def _sage_project(x_pad, w_stack, tm):
    n_pad, f_pad = x_pad.shape
    h2 = w_stack.shape[1]
    h_pad = h2 // 2
    return pl.pallas_call(
        sage_project_kernel,
        out_shape=(jax.ShapeDtypeStruct((n_pad, h_pad), jnp.bfloat16),
                   jax.ShapeDtypeStruct((n_pad, h_pad), jnp.bfloat16)),
        grid=(n_pad // tm,),
        in_specs=[pl.BlockSpec((tm, f_pad), lambda i: (i, 0)),
                  pl.BlockSpec((f_pad, h2), lambda i: (0, 0))],
        out_specs=(pl.BlockSpec((tm, h_pad), lambda i: (i, 0)),
                   pl.BlockSpec((tm, h_pad), lambda i: (i, 0))),
        compiler_params=_CP_1D,
    )(x_pad, w_stack)


def _sage_aggregate(a_pad, z, r, b_pad, tm, tk):
    n_pad = a_pad.shape[0]
    h_pad = z.shape[1]
    return pl.pallas_call(
        sage_aggregate_kernel,
        out_shape=jax.ShapeDtypeStruct((n_pad, h_pad), jnp.bfloat16),
        grid=(n_pad // tm, n_pad // tk),
        in_specs=[pl.BlockSpec((tm, tk), lambda i, k: (i, k)),
                  pl.BlockSpec((tk, h_pad), lambda i, k: (k, 0)),
                  pl.BlockSpec((tm, h_pad), lambda i, k: (i, 0)),
                  pl.BlockSpec((1, h_pad), lambda i, k: (0, 0))],
        out_specs=pl.BlockSpec((tm, h_pad), lambda i, k: (i, 0)),
        scratch_shapes=[pltpu.VMEM((tm, h_pad), jnp.float32)],
        compiler_params=_CP_2D,
    )(a_pad, z, r, b_pad)


def _final_linear(h1, h2, h3, w_pad, b_pad, tm):
    n_pad, h_pad = h1.shape
    c_pad = w_pad.shape[1]
    return pl.pallas_call(
        final_linear_kernel,
        out_shape=jax.ShapeDtypeStruct((n_pad, c_pad), jnp.float32),
        grid=(n_pad // tm,),
        in_specs=[pl.BlockSpec((tm, h_pad), lambda i: (i, 0)),
                  pl.BlockSpec((tm, h_pad), lambda i: (i, 0)),
                  pl.BlockSpec((tm, h_pad), lambda i: (i, 0)),
                  pl.BlockSpec((3 * h_pad, c_pad), lambda i: (0, 0)),
                  pl.BlockSpec((1, c_pad), lambda i: (0, 0))],
        out_specs=pl.BlockSpec((tm, c_pad), lambda i: (i, 0)),
        compiler_params=_CP_1D,
    )(h1, h2, h3, w_pad, b_pad)


# ----------------------------------------------------------------------------
# Model glue
# ----------------------------------------------------------------------------
def build_mean_adjacency(edge_index, num_nodes):
    src = edge_index[0]
    dst = edge_index[1]
    a = jnp.zeros((num_nodes, num_nodes), jnp.float32).at[dst, src].add(1.0)
    deg = jnp.sum(a, axis=1, keepdims=True)
    return a / jnp.maximum(deg, 1.0)  # zero in-degree rows stay all-zero


def nodegsage_forward(x, edge_index, params, hidden_size):
    n, f = x.shape
    h = hidden_size
    num_classes = params["blin"].shape[1]

    n_pad = _round_up(n, LANE)
    f_pad = _round_up(f, LANE)
    h_pad = _round_up(h, LANE)
    c_pad = _round_up(num_classes, LANE)
    tm = _pick_tile(n_pad, 256)
    tk = _pick_tile(n_pad, 512)

    # Dense row-normalized adjacency (mean aggregation), f32 math -> bf16.
    a = build_mean_adjacency(edge_index, n)
    a_pad = _pad2(a, n_pad, n_pad, jnp.float32).astype(jnp.bfloat16)
    x_pad = _pad2(x, n_pad, f_pad, jnp.float32).astype(jnp.bfloat16)

    def stack_lw(wl, wr, f_in_pad):
        w = jnp.zeros((f_in_pad, 2 * h_pad), jnp.float32)
        w = w.at[: wl.shape[0], : wl.shape[1]].set(wl)
        w = w.at[: wr.shape[0], h_pad:h_pad + wr.shape[1]].set(wr)
        return w.astype(jnp.bfloat16)

    w1 = stack_lw(params["wl1"], params["wr1"], f_pad)
    w2 = stack_lw(params["wl2"], params["wr2"], h_pad)
    w3 = stack_lw(params["wl3"], params["wr3"], h_pad)
    b1 = _pad2(params["b1"], 1, h_pad, jnp.float32)
    b2 = _pad2(params["b2"], 1, h_pad, jnp.float32)
    b3 = _pad2(params["b3"], 1, h_pad, jnp.float32)

    wlin = params["wlin"]  # (3H, C)
    wlin_pad = jnp.zeros((3 * h_pad, c_pad), jnp.float32)
    for j in range(3):
        wlin_pad = wlin_pad.at[j * h_pad: j * h_pad + h,
                               :num_classes].set(wlin[j * h:(j + 1) * h])
    wlin_pad = wlin_pad.astype(jnp.bfloat16)
    blin_pad = _pad2(params["blin"], 1, c_pad, jnp.float32)

    # Three SAGE layers: project ([z|r] = x @ [wl|wr]) then aggregate/norm/relu.
    z1, r1 = _sage_project(x_pad, w1, tm)
    h1 = _sage_aggregate(a_pad, z1, r1, b1, tm, tk)
    z2, r2 = _sage_project(h1, w2, tm)
    h2 = _sage_aggregate(a_pad, z2, r2, b2, tm, tk)
    z3, r3 = _sage_project(h2, w3, tm)
    h3 = _sage_aggregate(a_pad, z3, r3, b3, tm, tk)

    out_pad = _final_linear(h1, h2, h3, wlin_pad, blin_pad, tm)
    return out_pad[:n, :num_classes]


def init_params(key, num_features, num_classes, hidden_size):
    """PyTorch-Linear-style uniform init. Weights stored (in, out)."""
    def lin(k, fan_in, fan_out, bias):
        kw, kb = jax.random.split(k)
        bound = 1.0 / jnp.sqrt(jnp.float32(fan_in))
        w = jax.random.uniform(kw, (fan_in, fan_out), jnp.float32, -bound, bound)
        if not bias:
            return w, None
        b = jax.random.uniform(kb, (1, fan_out), jnp.float32, -bound, bound)
        return w, b

    keys = jax.random.split(key, 7)
    wl1, b1 = lin(keys[0], num_features, hidden_size, True)
    wr1, _ = lin(keys[1], num_features, hidden_size, False)
    wl2, b2 = lin(keys[2], hidden_size, hidden_size, True)
    wr2, _ = lin(keys[3], hidden_size, hidden_size, False)
    wl3, b3 = lin(keys[4], hidden_size, hidden_size, True)
    wr3, _ = lin(keys[5], hidden_size, hidden_size, False)
    wlin, blin = lin(keys[6], 3 * hidden_size, num_classes, True)
    return dict(wl1=wl1, wr1=wr1, b1=b1, wl2=wl2, wr2=wr2, b2=b2,
                wl3=wl3, wr3=wr3, b3=b3, wlin=wlin, blin=blin)


def reference_forward(x, edge_index, params):
    """Pure-JAX f32 reference mirroring the PyTorch semantics."""
    a = build_mean_adjacency(edge_index, x.shape[0])

    def sage(xx, wl, wr, b):
        h = (a @ xx) @ wl + xx @ wr + b
        norm = jnp.sqrt(jnp.sum(h * h, axis=1, keepdims=True))
        h = h / jnp.maximum(norm, 1e-12)
        return jnp.maximum(h, 0.0)

    h1 = sage(x, params["wl1"], params["wr1"], params["b1"])
    h2 = sage(h1, params["wl2"], params["wr2"], params["b2"])
    h3 = sage(h2, params["wl3"], params["wr3"], params["b3"])
    cat = jnp.concatenate([h1, h2, h3], axis=1)
    return cat @ params["wlin"] + params["blin"]


if __name__ == "__main__":
    NUM_NODES = 16
    NUM_FEATURES = 16
    HIDDEN = 32
    NUM_CLASSES = 4
    NUM_EDGES = 48

    key = jax.random.PRNGKey(0)
    kx, ke, kp = jax.random.split(key, 3)
    x = jax.random.normal(kx, (NUM_NODES, NUM_FEATURES), jnp.float32)
    edge_index = jax.random.randint(ke, (2, NUM_EDGES), 0, NUM_NODES, jnp.int32)
    params = init_params(kp, NUM_FEATURES, NUM_CLASSES, HIDDEN)

    fwd = jax.jit(functools.partial(nodegsage_forward, hidden_size=HIDDEN))
    out = jax.block_until_ready(fwd(x, edge_index, params))

    ref = reference_forward(x, edge_index, params)
    assert out.shape == (NUM_NODES, NUM_CLASSES)
    # bf16 MXU inputs -> relaxed tolerance vs the f32 reference.
    assert jnp.allclose(out, ref, atol=3e-2, rtol=3e-2), "mismatch vs pure-JAX reference"

    print("KERNEL_OK")
</pallas_src>

<mosaic_0001>
module attributes {stable_mosaic.version = 11 : i64} {
  func.func private @main(%arg0: i32) attributes {dimension_semantics = [#tpu.dimension_semantics<core_parallel>], iteration_bounds = array<i64: 2>, tpu.core_type = #tpu.core_type<sc_scalar_subcore>, window_params = []} {
    return
  }
}

module attributes {stable_mosaic.version = 11 : i64} {
  func.func private @main(%arg0: i32) attributes {dimension_semantics = [#tpu.dimension_semantics<core_parallel>], iteration_bounds = array<i64: 2>, tpu.core_type = #tpu.core_type<sc_scalar_subcore>, window_params = []} {
    return
  }
}

module attributes {stable_mosaic.version = 11 : i64} {
  func.func @sage_project_kernel(%arg0: i32, %arg1: memref<128x128xbf16, #tpu.memory_space<vmem>>, %arg2: memref<128x256xbf16, #tpu.memory_space<vmem>>, %arg3: memref<128x128xbf16, #tpu.memory_space<vmem>>, %arg4: memref<128x128xbf16, #tpu.memory_space<vmem>>) attributes {dimension_semantics = [#tpu.dimension_semantics<parallel>], iteration_bounds = array<i64: 1>, scalar_prefetch = 0 : i64, scratch_operands = 0 : i64, tpu.core_type = #tpu.core_type<tc>, window_params = [{transform_indices = @transform_0, window_bounds = array<i64: 128, 128>}, {pipeline_mode = #tpu.pipeline_mode<synchronous>, transform_indices = @transform_1, window_bounds = array<i64: 128, 256>}, {transform_indices = @transform_2, window_bounds = array<i64: 128, 128>}, {transform_indices = @transform_3, window_bounds = array<i64: 128, 128>}]} {
    %c0 = arith.constant 0 : index
    %c0_0 = arith.constant 0 : index
    %0 = vector.load %arg1[%c0, %c0_0] : memref<128x128xbf16, #tpu.memory_space<vmem>>, vector<128x128xbf16>
    %c0_1 = arith.constant 0 : index
    %c0_2 = arith.constant 0 : index
    %1 = vector.load %arg2[%c0_1, %c0_2] : memref<128x256xbf16, #tpu.memory_space<vmem>>, vector<128x256xbf16>
    %cst = arith.constant dense<0.000000e+00> : vector<128x256xf32>
    %2 = tpu.matmul %0, %1, %cst {dimension_numbers = #tpu.dot_dimension_numbers<[1], [0], [0], [1], [0, 0, 1, 1], [], []>} : vector<128x128xbf16>, vector<128x256xbf16>, vector<128x256xf32> -> vector<128x256xf32>
    %3 = vector.extract_strided_slice %2 {offsets = [0, 0], sizes = [128, 128], strides = [1, 1]} : vector<128x256xf32> to vector<128x128xf32>
    %4 = arith.truncf %3 : vector<128x128xf32> to vector<128x128xbf16>
    %c0_3 = arith.constant 0 : index
    %c0_4 = arith.constant 0 : index
    %5 = vector.load %arg3[%c0_3, %c0_4] : memref<128x128xbf16, #tpu.memory_space<vmem>>, vector<128x128xbf16>
    tpu.vector_store %arg3[%c0_3, %c0_4], %4 {strides = array<i32>} : memref<128x128xbf16, #tpu.memory_space<vmem>>, vector<128x128xbf16>,
    %6 = vector.extract_strided_slice %2 {offsets = [0, 128], sizes = [128, 128], strides = [1, 1]} : vector<128x256xf32> to vector<128x128xf32>
    %7 = arith.truncf %6 : vector<128x128xf32> to vector<128x128xbf16>
    %c0_5 = arith.constant 0 : index
    %c0_6 = arith.constant 0 : index
    %8 = vector.load %arg4[%c0_5, %c0_6] : memref<128x128xbf16, #tpu.memory_space<vmem>>, vector<128x128xbf16>
    tpu.vector_store %arg4[%c0_5, %c0_6], %7 {strides = array<i32>} : memref<128x128xbf16, #tpu.memory_space<vmem>>, vector<128x128xbf16>,
    return
  }
  func.func @transform_0(%arg0: i32) -> (i32, i32) {
    %c0_i32 = arith.constant 0 : i32
    %c0_i32_0 = arith.constant 0 : i32
    return %arg0, %c0_i32 : i32, i32
  }
  func.func @transform_1(%arg0: i32) -> (i32, i32) {
    %c0_i32 = arith.constant 0 : i32
    %c0_i32_0 = arith.constant 0 : i32
    %c0_i32_1 = arith.constant 0 : i32
    return %c0_i32, %c0_i32_0 : i32, i32
  }
  func.func @transform_2(%arg0: i32) -> (i32, i32) {
    %c0_i32 = arith.constant 0 : i32
    %c0_i32_0 = arith.constant 0 : i32
    return %arg0, %c0_i32 : i32, i32
  }
  func.func @transform_3(%arg0: i32) -> (i32, i32) {
    %c0_i32 = arith.constant 0 : i32
    %c0_i32_0 = arith.constant 0 : i32
    return %arg0, %c0_i32 : i32, i32
  }
}

module attributes {stable_mosaic.version = 11 : i64} {
  func.func @sage_aggregate_kernel(%arg0: i32, %arg1: i32, %arg2: memref<128x128xbf16, #tpu.memory_space<vmem>>, %arg3: memref<128x128xbf16, #tpu.memory_space<vmem>>, %arg4: memref<128x128xbf16, #tpu.memory_space<vmem>>, %arg5: memref<1x128xf32, #tpu.memory_space<vmem>>, %arg6: memref<128x128xbf16, #tpu.memory_space<vmem>>, %arg7: memref<128x128xf32, #tpu.memory_space<vmem>>) attributes {dimension_semantics = [#tpu.dimension_semantics<parallel>, #tpu.dimension_semantics<arbitrary>], iteration_bounds = array<i64: 1, 1>, scalar_prefetch = 0 : i64, scratch_operands = 1 : i64, tpu.core_type = #tpu.core_type<tc>, window_params = [{transform_indices = @transform_0, window_bounds = array<i64: 128, 128>}, {transform_indices = @transform_1, window_bounds = array<i64: 128, 128>}, {transform_indices = @transform_2, window_bounds = array<i64: 128, 128>}, {pipeline_mode = #tpu.pipeline_mode<synchronous>, transform_indices = @transform_3, window_bounds = array<i64: 1, 128>}, {transform_indices = @transform_4, window_bounds = array<i64: 128, 128>}]} {
    %c0_i32 = arith.constant 0 : i32
    %0 = arith.cmpi eq, %arg1, %c0_i32 : i32
    %1 = arith.extui %0 : i1 to i32
    %c0_i32_0 = arith.constant 0 : i32
    %2 = arith.cmpi ne, %1, %c0_i32_0 : i32
    scf.if %2 {
      %cst_10 = arith.constant 0.000000e+00 : f32
      %12 = vector.broadcast %cst_10 : f32 to vector<128x128xf32>
      %c0_11 = arith.constant 0 : index
      %c0_12 = arith.constant 0 : index
      %13 = vector.load %arg7[%c0_11, %c0_12] : memref<128x128xf32, #tpu.memory_space<vmem>>, vector<128x128xf32>
      tpu.vector_store %arg7[%c0_11, %c0_12], %12 {strides = array<i32>} : memref<128x128xf32, #tpu.memory_space<vmem>>, vector<128x128xf32>,
    } else {
    }
    %c0 = arith.constant 0 : index
    %c0_1 = arith.constant 0 : index
    %3 = vector.load %arg7[%c0, %c0_1] : memref<128x128xf32, #tpu.memory_space<vmem>>, vector<128x128xf32>
    %c0_2 = arith.constant 0 : index
    %c0_3 = arith.constant 0 : index
    %4 = vector.load %arg2[%c0_2, %c0_3] : memref<128x128xbf16, #tpu.memory_space<vmem>>, vector<128x128xbf16>
    %c0_4 = arith.constant 0 : index
    %c0_5 = arith.constant 0 : index
    %5 = vector.load %arg3[%c0_4, %c0_5] : memref<128x128xbf16, #tpu.memory_space<vmem>>, vector<128x128xbf16>
    %cst = arith.constant dense<0.000000e+00> : vector<128x128xf32>
    %6 = tpu.matmul %4, %5, %cst {dimension_numbers = #tpu.dot_dimension_numbers<[1], [0], [0], [1], [0, 0, 1, 1], [], []>} : vector<128x128xbf16>, vector<128x128xbf16>, vector<128x128xf32> -> vector<128x128xf32>
    %7 = arith.addf %3, %6 : vector<128x128xf32>
    %c0_6 = arith.constant 0 : index
    %c0_7 = arith.constant 0 : index
    %8 = vector.load %arg7[%c0_6, %c0_7] : memref<128x128xf32, #tpu.memory_space<vmem>>, vector<128x128xf32>
    tpu.vector_store %arg7[%c0_6, %c0_7], %7 {strides = array<i32>} : memref<128x128xf32, #tpu.memory_space<vmem>>, vector<128x128xf32>,
    %c0_i32_8 = arith.constant 0 : i32
    %9 = arith.cmpi eq, %arg1, %c0_i32_8 : i32
    %10 = arith.extui %9 : i1 to i32
    %c0_i32_9 = arith.constant 0 : i32
    %11 = arith.cmpi ne, %10, %c0_i32_9 : i32
    scf.if %11 {
      %c0_10 = arith.constant 0 : index
      %c0_11 = arith.constant 0 : index
      %12 = vector.load %arg7[%c0_10, %c0_11] : memref<128x128xf32, #tpu.memory_space<vmem>>, vector<128x128xf32>
      %c0_12 = arith.constant 0 : index
      %c0_13 = arith.constant 0 : index
      %13 = vector.load %arg4[%c0_12, %c0_13] : memref<128x128xbf16, #tpu.memory_space<vmem>>, vector<128x128xbf16>
      %14 = arith.extf %13 : vector<128x128xbf16> to vector<128x128xf32>
      %15 = arith.addf %12, %14 : vector<128x128xf32>
      %c0_14 = arith.constant 0 : index
      %c0_15 = arith.constant 0 : index
      %16 = vector.load %arg5[%c0_14, %c0_15] : memref<1x128xf32, #tpu.memory_space<vmem>>, vector<1x128xf32>
      %17 = vector.broadcast %16 : vector<1x128xf32> to vector<128x128xf32>
      %18 = arith.addf %15, %17 : vector<128x128xf32>
      %19 = arith.mulf %18, %18 : vector<128x128xf32>
      %cst_16 = arith.constant dense<0.000000e+00> : vector<128xf32>
      %20 = vector.multi_reduction <add>, %19, %cst_16 [1] : vector<128x128xf32> to vector<128xf32>
      %21 = vector.shape_cast %20 : vector<128xf32> to vector<128x1xf32>
      %cst_17 = arith.constant 1.000000e-24 : f32
      %22 = vector.broadcast %cst_17 : f32 to vector<128x1xf32>
      %23 = arith.maximumf %21, %22 : vector<128x1xf32>
      %24 = math.rsqrt %23 : vector<128x1xf32>
      %25 = vector.broadcast %24 : vector<128x1xf32> to vector<128x128xf32>
      %26 = arith.mulf %18, %25 : vector<128x128xf32>
      %cst_18 = arith.constant 0.000000e+00 : f32
      %27 = vector.broadcast %cst_18 : f32 to vector<128x128xf32>
      %28 = arith.maximumf %26, %27 : vector<128x128xf32>
      %29 = arith.truncf %28 : vector<128x128xf32> to vector<128x128xbf16>
      %c0_19 = arith.constant 0 : index
      %c0_20 = arith.constant 0 : index
      %30 = vector.load %arg6[%c0_19, %c0_20] : memref<128x128xbf16, #tpu.memory_space<vmem>>, vector<128x128xbf16>
      tpu.vector_store %arg6[%c0_19, %c0_20], %29 {strides = array<i32>} : memref<128x128xbf16, #tpu.memory_space<vmem>>, vector<128x128xbf16>,
    } else {
    }
    return
  }
  func.func @transform_0(%arg0: i32, %arg1: i32) -> (i32, i32) {
    %c0_i32 = arith.constant 0 : i32
    return %arg0, %arg1 : i32, i32
  }
  func.func @transform_1(%arg0: i32, %arg1: i32) -> (i32, i32) {
    %c0_i32 = arith.constant 0 : i32
    %c0_i32_0 = arith.constant 0 : i32
    return %arg1, %c0_i32 : i32, i32
  }
  func.func @transform_2(%arg0: i32, %arg1: i32) -> (i32, i32) {
    %c0_i32 = arith.constant 0 : i32
    %c0_i32_0 = arith.constant 0 : i32
    return %arg0, %c0_i32 : i32, i32
  }
  func.func @transform_3(%arg0: i32, %arg1: i32) -> (i32, i32) {
    %c0_i32 = arith.constant 0 : i32
    %c0_i32_0 = arith.constant 0 : i32
    %c0_i32_1 = arith.constant 0 : i32
    return %c0_i32, %c0_i32_0 : i32, i32
  }
  func.func @transform_4(%arg0: i32, %arg1: i32) -> (i32, i32) {
    %c0_i32 = arith.constant 0 : i32
    %c0_i32_0 = arith.constant 0 : i32
    return %arg0, %c0_i32 : i32, i32
  }
}

module attributes {stable_mosaic.version = 11 : i64} {
  func.func @final_linear_kernel(%arg0: i32, %arg1: memref<128x128xbf16, #tpu.memory_space<vmem>>, %arg2: memref<128x128xbf16, #tpu.memory_space<vmem>>, %arg3: memref<128x128xbf16, #tpu.memory_space<vmem>>, %arg4: memref<384x128xbf16, #tpu.memory_space<vmem>>, %arg5: memref<1x128xf32, #tpu.memory_space<vmem>>, %arg6: memref<128x128xf32, #tpu.memory_space<vmem>>) attributes {dimension_semantics = [#tpu.dimension_semantics<parallel>], iteration_bounds = array<i64: 1>, scalar_prefetch = 0 : i64, scratch_operands = 0 : i64, tpu.core_type = #tpu.core_type<tc>, window_params = [{transform_indices = @transform_0, window_bounds = array<i64: 128, 128>}, {transform_indices = @transform_1, window_bounds = array<i64: 128, 128>}, {transform_indices = @transform_2, window_bounds = array<i64: 128, 128>}, {pipeline_mode = #tpu.pipeline_mode<synchronous>, transform_indices = @transform_3, window_bounds = array<i64: 384, 128>}, {pipeline_mode = #tpu.pipeline_mode<synchronous>, transform_indices = @transform_4, window_bounds = array<i64: 1, 128>}, {transform_indices = @transform_5, window_bounds = array<i64: 128, 128>}]} {
    %c0 = arith.constant 0 : index
    %c0_0 = arith.constant 0 : index
    %0 = vector.load %arg1[%c0, %c0_0] : memref<128x128xbf16, #tpu.memory_space<vmem>>, vector<128x128xbf16>
    %c0_1 = arith.constant 0 : index
    %c0_2 = arith.constant 0 : index
    %1 = vector.load %arg2[%c0_1, %c0_2] : memref<128x128xbf16, #tpu.memory_space<vmem>>, vector<128x128xbf16>
    %c0_3 = arith.constant 0 : index
    %c0_4 = arith.constant 0 : index
    %2 = vector.load %arg3[%c0_3, %c0_4] : memref<128x128xbf16, #tpu.memory_space<vmem>>, vector<128x128xbf16>
    %3 = tpu.concatenate %0, %1, %2 in 1 : vector<128x128xbf16>, vector<128x128xbf16>, vector<128x128xbf16> -> vector<128x384xbf16>
    %c0_5 = arith.constant 0 : index
    %c0_6 = arith.constant 0 : index
    %4 = vector.load %arg4[%c0_5, %c0_6] : memref<384x128xbf16, #tpu.memory_space<vmem>>, vector<384x128xbf16>
    %cst = arith.constant dense<0.000000e+00> : vector<128x128xf32>
    %5 = tpu.matmul %3, %4, %cst {dimension_numbers = #tpu.dot_dimension_numbers<[1], [0], [0], [1], [0, 0, 1, 1], [], []>} : vector<128x384xbf16>, vector<384x128xbf16>, vector<128x128xf32> -> vector<128x128xf32>
    %c0_7 = arith.constant 0 : index
    %c0_8 = arith.constant 0 : index
    %6 = vector.load %arg5[%c0_7, %c0_8] : memref<1x128xf32, #tpu.memory_space<vmem>>, vector<1x128xf32>
    %7 = vector.broadcast %6 : vector<1x128xf32> to vector<128x128xf32>
    %8 = arith.addf %5, %7 : vector<128x128xf32>
    %c0_9 = arith.constant 0 : index
    %c0_10 = arith.constant 0 : index
    %9 = vector.load %arg6[%c0_9, %c0_10] : memref<128x128xf32, #tpu.memory_space<vmem>>, vector<128x128xf32>
    tpu.vector_store %arg6[%c0_9, %c0_10], %8 {strides = array<i32>} : memref<128x128xf32, #tpu.memory_space<vmem>>, vector<128x128xf32>,
    return
  }
  func.func @transform_0(%arg0: i32) -> (i32, i32) {
    %c0_i32 = arith.constant 0 : i32
    %c0_i32_0 = arith.constant 0 : i32
    return %arg0, %c0_i32 : i32, i32
  }
  func.func @transform_1(%arg0: i32) -> (i32, i32) {
    %c0_i32 = arith.constant 0 : i32
    %c0_i32_0 = arith.constant 0 : i32
    return %arg0, %c0_i32 : i32, i32
  }
  func.func @transform_2(%arg0: i32) -> (i32, i32) {
    %c0_i32 = arith.constant 0 : i32
    %c0_i32_0 = arith.constant 0 : i32
    return %arg0, %c0_i32 : i32, i32
  }
  func.func @transform_3(%arg0: i32) -> (i32, i32) {
    %c0_i32 = arith.constant 0 : i32
    %c0_i32_0 = arith.constant 0 : i32
    %c0_i32_1 = arith.constant 0 : i32
    return %c0_i32, %c0_i32_0 : i32, i32
  }
  func.func @transform_4(%arg0: i32) -> (i32, i32) {
    %c0_i32 = arith.constant 0 : i32
    %c0_i32_0 = arith.constant 0 : i32
    %c0_i32_1 = arith.constant 0 : i32
    return %c0_i32, %c0_i32_0 : i32, i32
  }
  func.func @transform_5(%arg0: i32) -> (i32, i32) {
    %c0_i32 = arith.constant 0 : i32
    %c0_i32_0 = arith.constant 0 : i32
    return %arg0, %c0_i32 : i32, i32
  }
}

</mosaic_0001>

<bundles_post_ra>
// kernel: nodegsage_forward.7
= control target key start
LH: loop header
LB: loop body
LE: loop exit
PB: predicated region body
PF: predicated region fallthrough
CT: control target
= control target key end

     0   :  { %v686_v1 = vmov 0   ;;  %s835_s1 = inlined_call_operand.vmem [shape: bf16[128,256], index: 1, kind: input, shape index: {}]   ;;  %s836_s0 = inlined_call_operand.vmem [shape: bf16[128,128], index: 0, kind: input, shape index: {}]   ;;  %s837_s2 = inlined_call_operand.vmem [shape: bf16[128,128], index: 2, kind: output, shape index: {0}]   ;;  %s838_s3 = inlined_call_operand.vmem [shape: bf16[128,128], index: 3, kind: output, shape index: {1}]  }
   0x1   :  { %v654_v0 = vld [vmem:[%s835_s1 + $0x4] ss:$8 sps:$4 sm:$0xff]   ;;  %206 = vmatprep.mubr.bf16.mxu0 %v686_v1  ;;  %246 = vmatprep.mubr.bf16.mxu1 %v686_v1  ;;  %v656_v2 = vld [vmem:[%s835_s1] ss:$8 sps:$4 sm:$0xff]   ;;  %v657_v3 = vld [vmem:[%s835_s1 + $0x14] ss:$8 sps:$4 sm:$0xff]  }
   0x2   :  { %174 = vmatprep.subr.bf16.mxu0 %v654_v0  ;;  %637 = vmatprep.subr.bf16.mxu1 %v654_v0  ;;  %v659_v4 = vld [vmem:[%s835_s1 + $0x10] ss:$8 sps:$4 sm:$0xff]   ;;  %v660_v5 = vld [vmem:[%s835_s1 + $0x24] ss:$8 sps:$4 sm:$0xff]   ;;  %v662_v6 = vld [vmem:[%s835_s1 + $0x20] ss:$8 sps:$4 sm:$0xff]  }
   0x3   :  { %175 = vmatpush1.bf16.msra.mxu0 %v656_v2  ;;  %645 = vmatpush1.bf16.msra.mxu1 %v656_v2  ;;  %v663_v7 = vld [vmem:[%s835_s1 + $0x34] ss:$8 sps:$4 sm:$0xff]   ;;  %v665_v8 = vld [vmem:[%s835_s1 + $0x30] ss:$8 sps:$4 sm:$0xff]   ;;  %v666_v9 = vld [vmem:[%s835_s1 + $0x44] ss:$8 sps:$4 sm:$0xff]  }
   0x4   :  { %176 = vmatprep.subr.bf16.mxu0 %v657_v3  ;;  %638 = vmatprep.subr.bf16.mxu1 %v657_v3  ;;  %v668_v10 = vld [vmem:[%s835_s1 + $0x40] ss:$8 sps:$4 sm:$0xff]   ;;  %v669_v11 = vld [vmem:[%s835_s1 + $0x54] ss:$8 sps:$4 sm:$0xff]   ;;  %v671_v12 = vld [vmem:[%s835_s1 + $0x50] ss:$8 sps:$4 sm:$0xff]  }
   0x5   :  { %v672_v13 = vld [vmem:[%s835_s1 + $0x64] ss:$8 sps:$4 sm:$0xff]   ;;  %v674_v14 = vld [vmem:[%s835_s1 + $0x60] ss:$8 sps:$4 sm:$0xff]   ;;  %v675_v15 = vld [vmem:[%s835_s1 + $0x74] ss:$8 sps:$4 sm:$0xff]  }
   0x6   :  { %v677_v16 = vld [vmem:[%s835_s1 + $0x70] ss:$8 sps:$4 sm:$0xff]   ;;  %v678_v17 = vld [vmem:[%s836_s0] sm:$0xff]   ;;  %v680_v19 = vld [vmem:[%s836_s0 + $0x8] sm:$0xff]  }
   0x7   :  { %177 = vmatpush1.bf16.msra.mxu0 %v659_v4  ;;  %646 = vmatpush1.bf16.msra.mxu1 %v659_v4  ;;  %v679_v18 = vld [vmem:[%s836_s0 + $0x20] sm:$0xff]   ;;  %v681_v20 = vld [vmem:[%s836_s0 + $0x28] sm:$0xff]   ;;  %v682_v21 = vld [vmem:[%s836_s0 + $0x10] sm:$0xff]  }
   0x8   :  { %178 = vmatprep.subr.bf16.mxu0 %v660_v5  ;;  %639 = vmatprep.subr.bf16.mxu1 %v660_v5  ;;  %v683_v22 = vld [vmem:[%s836_s0 + $0x30] sm:$0xff]   ;;  %v684_v23 = vld [vmem:[%s836_s0 + $0x18] sm:$0xff]  }
   0x9   :  { %v685_v24 = vld [vmem:[%s836_s0 + $0x38] sm:$0xff]  }
   0xb   :  { %179 = vmatpush1.bf16.msra.mxu0 %v662_v6  ;;  %647 = vmatpush1.bf16.msra.mxu1 %v662_v6 }
   0xc   :  { %180 = vmatprep.subr.bf16.mxu0 %v663_v7  ;;  %640 = vmatprep.subr.bf16.mxu1 %v663_v7 }
   0xf   :  { %181 = vmatpush1.bf16.msra.mxu0 %v665_v8  ;;  %648 = vmatpush1.bf16.msra.mxu1 %v665_v8 }
  0x10   :  { %182 = vmatprep.subr.bf16.mxu0 %v666_v9  ;;  %641 = vmatprep.subr.bf16.mxu1 %v666_v9 }
  0x13   :  { %183 = vmatpush1.bf16.msra.mxu0 %v668_v10  ;;  %649 = vmatpush1.bf16.msra.mxu1 %v668_v10 }
  0x14   :  { %184 = vmatprep.subr.bf16.mxu0 %v669_v11  ;;  %642 = vmatprep.subr.bf16.mxu1 %v669_v11 }
  0x17   :  { %185 = vmatpush1.bf16.msra.mxu0 %v671_v12  ;;  %650 = vmatpush1.bf16.msra.mxu1 %v671_v12 }
  0x18   :  { %186 = vmatprep.subr.bf16.mxu0 %v672_v13  ;;  %643 = vmatprep.subr.bf16.mxu1 %v672_v13 }
  0x1b   :  { %187 = vmatpush1.bf16.msra.mxu0 %v674_v14  ;;  %651 = vmatpush1.bf16.msra.mxu1 %v674_v14 }
  0x1c   :  { %188 = vmatprep.subr.bf16.mxu0 %v675_v15  ;;  %644 = vmatprep.subr.bf16.mxu1 %v675_v15 }
  0x1f   :  { %189 = vmatpush1.bf16.msra.mxu0 %v677_v16  ;;  %652 = vmatpush1.bf16.msra.mxu1 %v677_v16 }
  0x22   :  { %207 = vmatmul.mubr.bf16.vlgmr.msra.gmra.mrb[0].mxu0 %v678_v17  ;;  %247 = vmatmul.mubr.bf16.vlgmr.msra.gmra.mrb[0].mxu1 %v679_v18 }
  0x23   :  { %216 = vmatprep.mubr.bf16.mxu0 %v686_v1  ;;  %256 = vmatprep.mubr.bf16.mxu1 %v686_v1 }
  0x2a   :  { %217 = vmatmul.mubr.bf16.gmra.mrb[4].mxu0 %v680_v19  ;;  %257 = vmatmul.mubr.bf16.gmra.mrb[4].mxu1 %v681_v20 }
  0x2b   :  { %226 = vmatprep.mubr.bf16.mxu0 %v686_v1  ;;  %266 = vmatprep.mubr.bf16.mxu1 %v686_v1 }
  0x32   :  { %227 = vmatmul.mubr.bf16.gmra.mrb[8].mxu0 %v682_v21  ;;  %267 = vmatmul.mubr.bf16.gmra.mrb[8].mxu1 %v683_v22 }
  0x33   :  { %236 = vmatprep.mubr.bf16.mxu0 %v686_v1  ;;  %276 = vmatprep.mubr.bf16.mxu1 %v686_v1 }
  0x3a   :  { %237 = vmatmul.mubr.bf16.gmra.mrb[12].mxu0 %v684_v23  ;;  %277 = vmatmul.mubr.bf16.gmra.mrb[12].mxu1 %v685_v24 }
  0xf5   :  { %v208_v25 = vpop.f32.mrb[0].mxu0  ;;  %v248_v26 = vpop.f32.mrb[0].mxu1 }
  0xf6   :  { %v210_v27 = vpop.f32.mrb[1].mxu0  ;;  %v250_v28 = vpop.f32.mrb[1].mxu1 }
  0xf7   :  { %v212_v29 = vpop.f32.mrb[2].mxu0  ;;  %v252_v30 = vpop.f32.mrb[2].mxu1 }
  0xf8   :  { %v546_v31 = vpack.c.bf16 %v212_v29, %v208_v25  ;;  %v566_v32 = vpack.c.bf16 %v252_v30, %v248_v26  ;;  %v214_v33 = vpop.f32.mrb[3].mxu0  ;;  %v254_v34 = vpop.f32.mrb[3].mxu1 }
  0xf9   :  { %v586_v35 = vpack.c.bf16 %v214_v33, %v210_v27  ;;  %v606_v36 = vpack.c.bf16 %v254_v34, %v250_v28 }
  0xfa   :  { %547 = vst [vmem:[%s837_s2] sm:$0xff] %v546_v31   ;;  %626 = vst [vmem:[%s837_s2 + $0x20] sm:$0xff] %v566_v32  }
  0xfb   :  { %587 = vst [vmem:[%s838_s3] sm:$0xff] %v586_v35   ;;  %633 = vst [vmem:[%s838_s3 + $0x20] sm:$0xff] %v606_v36  }
  0xfd   :  { %v218_v37 = vpop.f32.mrb[4].mxu0  ;;  %v258_v38 = vpop.f32.mrb[4].mxu1 }
  0xfe   :  { %v220_v39 = vpop.f32.mrb[5].mxu0  ;;  %v260_v40 = vpop.f32.mrb[5].mxu1 }
  0xff   :  { %v222_v41 = vpop.f32.mrb[6].mxu0  ;;  %v262_v42 = vpop.f32.mrb[6].mxu1 }
 0x100   :  { %v551_v43 = vpack.c.bf16 %v222_v41, %v218_v37  ;;  %v571_v44 = vpack.c.bf16 %v262_v42, %v258_v38  ;;  %v224_v45 = vpop.f32.mrb[7].mxu0  ;;  %v264_v46 = vpop.f32.mrb[7].mxu1 }
 0x101   :  { %v591_v47 = vpack.c.bf16 %v224_v45, %v220_v39  ;;  %v611_v48 = vpack.c.bf16 %v264_v46, %v260_v40 }
 0x102   :  { %623 = vst [vmem:[%s837_s2 + $0x8] sm:$0xff] %v551_v43   ;;  %627 = vst [vmem:[%s837_s2 + $0x28] sm:$0xff] %v571_v44  }
 0x103   :  { %630 = vst [vmem:[%s838_s3 + $0x8] sm:$0xff] %v591_v47   ;;  %634 = vst [vmem:[%s838_s3 + $0x28] sm:$0xff] %v611_v48  }
 0x105   :  { %v228_v49 = vpop.f32.mrb[8].mxu0  ;;  %v268_v50 = vpop.f32.mrb[8].mxu1 }
 0x106   :  { %v230_v51 = vpop.f32.mrb[9].mxu0  ;;  %v270_v52 = vpop.f32.mrb[9].mxu1 }
 0x107   :  { %v232_v53 = vpop.f32.mrb[10].mxu0  ;;  %v272_v54 = vpop.f32.mrb[10].mxu1 }
 0x108   :  { %v556_v55 = vpack.c.bf16 %v232_v53, %v228_v49  ;;  %v576_v56 = vpack.c.bf16 %v272_v54, %v268_v50  ;;  %v234_v57 = vpop.f32.mrb[11].mxu0  ;;  %v274_v58 = vpop.f32.mrb[11].mxu1 }
 0x109   :  { %v596_v59 = vpack.c.bf16 %v234_v57, %v230_v51  ;;  %v616_v60 = vpack.c.bf16 %v274_v58, %v270_v52 }
 0x10a   :  { %624 = vst [vmem:[%s837_s2 + $0x10] sm:$0xff] %v556_v55   ;;  %628 = vst [vmem:[%s837_s2 + $0x30] sm:$0xff] %v576_v56  }
 0x10b   :  { %631 = vst [vmem:[%s838_s3 + $0x10] sm:$0xff] %v596_v59   ;;  %635 = vst [vmem:[%s838_s3 + $0x30] sm:$0xff] %v616_v60  }
 0x10d   :  { %v238_v61 = vpop.f32.mrb[12].mxu0  ;;  %v278_v62 = vpop.f32.mrb[12].mxu1 }
 0x10e   :  { %v240_v63 = vpop.f32.mrb[13].mxu0  ;;  %v280_v0 = vpop.f32.mrb[13].mxu1 }
 0x10f   :  { %v242_v1 = vpop.f32.mrb[14].mxu0  ;;  %v282_v2 = vpop.f32.mrb[14].mxu1 }
 0x110   :  { %v561_v3 = vpack.c.bf16 %v242_v1, %v238_v61  ;;  %v581_v4 = vpack.c.bf16 %v282_v2, %v278_v62  ;;  %v244_v5 = vpop.f32.mrb[15].mxu0  ;;  %v284_v6 = vpop.f32.mrb[15].mxu1 }
 0x111   :  { %v601_v7 = vpack.c.bf16 %v244_v5, %v240_v63  ;;  %v621_v8 = vpack.c.bf16 %v284_v6, %v280_v0 }
 0x112   :  { %625 = vst [vmem:[%s837_s2 + $0x18] sm:$0xff] %v561_v3   ;;  %629 = vst [vmem:[%s837_s2 + $0x38] sm:$0xff] %v581_v4  }
 0x113   :  { %632 = vst [vmem:[%s838_s3 + $0x18] sm:$0xff] %v601_v7   ;;  %636 = vst [vmem:[%s838_s3 + $0x38] sm:$0xff] %v621_v8  }

// kernel: nodegsage_forward.8
= control target key start
LH: loop header
LB: loop body
LE: loop exit
PB: predicated region body
PF: predicated region fallthrough
CT: control target
= control target key end

     0   :  { %s1066_s1 = inlined_call_operand.vmem [shape: bf16[128,128], index: 1, kind: input, shape index: {}]   ;;  %s1067_s0 = inlined_call_operand.vmem [shape: bf16[128,128], index: 0, kind: input, shape index: {}]   ;;  %s1068_s2 = inlined_call_operand.vmem [shape: bf16[128,128], index: 2, kind: input, shape index: {}]   ;;  %s1069_s3 = inlined_call_operand.vmem [shape: f32[1,128], index: 3, kind: input, shape index: {}]   ;;  %s1070_s4 = inlined_call_operand.vmem [shape: bf16[128,128], index: 4, kind: output, shape index: {}]  }
   0x1   :  { %v796_v0 = vld [vmem:[%s1066_s1] sm:$0xff]   ;;  %v797_v1 = vld [vmem:[%s1066_s1 + $0x8] sm:$0xff]   ;;  %v798_v2 = vld [vmem:[%s1066_s1 + $0x10] sm:$0xff]  }
   0x2   :  { %748 = vmatprep.subr.bf16.mxu0 %v796_v0  ;;  %780 = vmatprep.subr.bf16.mxu1 %v796_v0  ;;  %v799_v3 = vld [vmem:[%s1066_s1 + $0x18] sm:$0xff]   ;;  %v804_v4 = vld [vmem:[%s1067_s0] sm:$0xff]   ;;  %v801_v7 = vld [vmem:[%s1066_s1 + $0x28] sm:$0xff]  }
   0x3   :  { %749 = vmatpush3.bf16.msra.mxu0 %v796_v0  ;;  %788 = vmatpush3.bf16.msra.mxu1 %v796_v0  ;;  %v805_v5 = vld [vmem:[%s1067_s0 + $0x20] sm:$0xff]   ;;  %v802_v8 = vld [vmem:[%s1066_s1 + $0x30] sm:$0xff]   ;;  %v803_v9 = vld [vmem:[%s1066_s1 + $0x38] sm:$0xff]  }
   0x4   :  { %750 = vmatprep.subr.bf16.mxu0 %v797_v1  ;;  %781 = vmatprep.subr.bf16.mxu1 %v797_v1  ;;  %v800_v6 = vld [vmem:[%s1066_s1 + $0x20] sm:$0xff]   ;;  %v806_v10 = vld [vmem:[%s1067_s0 + $0x8] sm:$0xff]   ;;  %v808_v12 = vld [vmem:[%s1067_s0 + $0x10] sm:$0xff]  }
   0x5   :  { %764 = vmatprep.mubr.bf16.mxu0 %v804_v4  ;;  %772 = vmatprep.mubr.bf16.mxu1 %v805_v5  ;;  %v807_v11 = vld [vmem:[%s1067_s0 + $0x28] sm:$0xff]   ;;  %v810_v13 = vld [vmem:[%s1067_s0 + $0x30] sm:$0xff]   ;;  %v809_v14 = vld [vmem:[%s1067_s0 + $0x18] sm:$0xff]  }
   0x6   :  { %v811_v15 = vld [vmem:[%s1067_s0 + $0x38] sm:$0xff]   ;;  %v718_v16 = vld [vmem:[%s1068_s2 + $0x8] sm:$0xff]   ;;  %v647_v18 = vld [vmem:[%s1068_s2] sm:$0xff]  }
   0x7   :  { %751 = vmatpush3.bf16.msra.mxu0 %v797_v1  ;;  %789 = vmatpush3.bf16.msra.mxu1 %v797_v1  ;;  %v722_v17 = vld [vmem:[%s1068_s2 + $0x28] sm:$0xff]   ;;  %v652_v19 = vunpack.c.l.bf16 %v718_v16  ;;  %v721_v21 = vld [vmem:[%s1068_s2 + $0x20] sm:$0xff]   ;;  %v648_v22 = vunpack.c.l.bf16 %v647_v18  ;;  %v653_v23 = vunpack.c.h.bf16 %v718_v16  ;;  %v649_v43 = vunpack.c.h.bf16 %v647_v18  ;;  %v720_v49 = vld [vmem:[%s1068_s2 + $0x18] sm:$0xff]  }
   0x8   :  { %752 = vmatprep.subr.bf16.mxu0 %v798_v2  ;;  %782 = vmatprep.subr.bf16.mxu1 %v798_v2  ;;  %v668_v20 = vunpack.c.l.bf16 %v722_v17  ;;  %v932_v26 = vld [vmem:[%s1069_s3] ss:$0 sm:$0xff]  ;;  %v664_v27 = vunpack.c.l.bf16 %v721_v21  ;;  %v669_v28 = vunpack.c.h.bf16 %v722_v17  ;;  %v665_v44 = vunpack.c.h.bf16 %v721_v21  ;;  %v719_v61 = vld [vmem:[%s1068_s2 + $0x10] sm:$0xff]  }
   0x9   :  { %v660_v53 = vunpack.c.l.bf16 %v720_v49  ;;  %v661_v54 = vunpack.c.h.bf16 %v720_v49  ;;  %v656_v5 = vunpack.c.l.bf16 %v719_v61 }
   0xb   :  { %753 = vmatpush3.bf16.msra.mxu0 %v798_v2  ;;  %790 = vmatpush3.bf16.msra.mxu1 %v798_v2 }
   0xc   :  { %754 = vmatprep.subr.bf16.mxu0 %v799_v3  ;;  %783 = vmatprep.subr.bf16.mxu1 %v799_v3 }
   0xf   :  { %755 = vmatpush3.bf16.msra.mxu0 %v799_v3  ;;  %791 = vmatpush3.bf16.msra.mxu1 %v799_v3 }
  0x10   :  { %756 = vmatprep.subr.bf16.mxu0 %v800_v6  ;;  %784 = vmatprep.subr.bf16.mxu1 %v800_v6 }
  0x13   :  { %757 = vmatpush3.bf16.msra.mxu0 %v800_v6  ;;  %792 = vmatpush3.bf16.msra.mxu1 %v800_v6  ;;  %v657_v6 = vunpack.c.h.bf16 %v719_v61 }
  0x14   :  { %758 = vmatprep.subr.bf16.mxu0 %v801_v7  ;;  %785 = vmatprep.subr.bf16.mxu1 %v801_v7 }
  0x17   :  { %759 = vmatpush3.bf16.msra.mxu0 %v801_v7  ;;  %793 = vmatpush3.bf16.msra.mxu1 %v801_v7 }
  0x18   :  { %760 = vmatprep.subr.bf16.mxu0 %v802_v8  ;;  %786 = vmatprep.subr.bf16.mxu1 %v802_v8 }
  0x1b   :  { %761 = vmatpush3.bf16.msra.mxu0 %v802_v8  ;;  %794 = vmatpush3.bf16.msra.mxu1 %v802_v8 }
  0x1c   :  { %762 = vmatprep.subr.bf16.mxu0 %v803_v9  ;;  %787 = vmatprep.subr.bf16.mxu1 %v803_v9 }
  0x1f   :  { %763 = vmatpush3.bf16.msra.mxu0 %v803_v9  ;;  %795 = vmatpush3.bf16.msra.mxu1 %v803_v9 }
  0x22   :  { %765 = vmatmul.mubr.bf16.vlgmr.msra.gmra.mrb[0].mxu0 %v806_v10  ;;  %773 = vmatmul.mubr.bf16.vlgmr.msra.gmra.mrb[0].mxu1 %v807_v11  ;;  %v723_v11 = vld [vmem:[%s1068_s2 + $0x30] sm:$0xff]  }
  0x23   :  { %768 = vmatprep.mubr.bf16.mxu0 %v808_v12  ;;  %776 = vmatprep.mubr.bf16.mxu1 %v810_v13  ;;  %v672_v13 = vunpack.c.l.bf16 %v723_v11 }
  0x2a   :  { %769 = vmatmul.mubr.bf16.gmra.mrb[4].mxu0 %v809_v14  ;;  %777 = vmatmul.mubr.bf16.gmra.mrb[4].mxu1 %v811_v15  ;;  %v673_v15 = vunpack.c.h.bf16 %v723_v11 }
  0xf5   :  { %v766_v24 = vpop.f32.mrb[0].mxu0  ;;  %v774_v25 = vpop.f32.mrb[0].mxu1 }
  0xf6   :  { %v364_v29 = vadd.f32 %v766_v24, %v652_v19  ;;  %v372_v30 = vadd.f32 %v774_v25, %v668_v20  ;;  %v216_v31 = vpop.f32.mrb[1].mxu0  ;;  %v248_v32 = vpop.f32.mrb[1].mxu1  ;;  %v724_v19 = vld [vmem:[%s1068_s2 + $0x38] sm:$0xff]  }
  0xf7   :  { %v362_v33 = vadd.f32 %v648_v22, %v216_v31  ;;  %v767_v34 = vpop.f32.mrb[2].mxu0  ;;  %v775_v35 = vpop.f32.mrb[2].mxu1  ;;  %v370_v41 = vadd.f32 %v664_v27, %v248_v32  ;;  %v676_v22 = vunpack.c.l.bf16 %v724_v19  ;;  %v677_v24 = vunpack.c.h.bf16 %v724_v19 }
  0xf8   :  { %v365_v36 = vadd.f32 %v767_v34, %v653_v23  ;;  %v219_v37 = vpop.f32.mrb[3].mxu0  ;;  %v251_v38 = vpop.f32.mrb[3].mxu1  ;;  %v935_v39 = vadd.f32 %v932_v26, %v372_v30  ;;  %v938_v40 = vadd.f32 %v932_v26, %v364_v29  ;;  %v373_v42 = vadd.f32 %v775_v35, %v669_v28 }
  0xf9   :  { %v941_v45 = vadd.f32 %v932_v26, %v362_v33  ;;  %v363_v50 = vadd.f32 %v649_v43, %v219_v37  ;;  %v371_v51 = vadd.f32 %v665_v44, %v251_v38  ;;  %v954_v56 = vadd.f32 %v932_v26, %v370_v41 }
  0xfa   :  { %v944_v46 = vadd.f32 %v932_v26, %v365_v36  ;;  %v411_v47 = vmul.f32 %v935_v39, %v935_v39  ;;  %v403_v48 = vmul.f32 %v938_v40, %v938_v40  ;;  %v957_v57 = vadd.f32 %v932_v26, %v373_v42 }
  0xfb   :  { %v401_v58 = vmul.f32 %v941_v45, %v941_v45  ;;  %v967_v3 = vadd.f32 %v932_v26, %v363_v50  ;;  %v970_v4 = vadd.f32 %v932_v26, %v371_v51  ;;  %v409_v9 = vmul.f32 %v954_v56, %v954_v56 }
  0xfc   :  { %437 = vadd.xlane.f32.xlu0 %v411_v47  ;;  %421 = vadd.xlane.f32.xlu1 %v403_v48  ;;  %v404_v59 = vmul.f32 %v944_v46, %v944_v46  ;;  %v412_v10 = vmul.f32 %v957_v57, %v957_v57 }
  0xfd   :  { %v770_v52 = vpop.f32.mrb[4].mxu0  ;;  %v778_v55 = vpop.f32.mrb[4].mxu1  ;;  %v410_v14 = vmul.f32 %v970_v4, %v970_v4  ;;  %v402_v20 = vmul.f32 %v967_v3, %v967_v3 }
  0xfe   :  { %v232_v60 = vpop.f32.mrb[5].mxu0  ;;  %v264_v62 = vpop.f32.mrb[5].mxu1  ;;  %v368_v7 = vadd.f32 %v770_v52, %v660_v53  ;;  %v376_v30 = vadd.f32 %v778_v55, %v676_v22 }
  0xff   :  { %v771_v63 = vpop.f32.mrb[6].mxu0  ;;  %v779_v0 = vpop.f32.mrb[6].mxu1  ;;  %v366_v12 = vadd.f32 %v656_v5, %v232_v60  ;;  %v374_v23 = vadd.f32 %v672_v13, %v264_v62 }
 0x100   :  { %417 = vadd.xlane.f32.xlu0 %v401_v58  ;;  %423 = vadd.xlane.f32.xlu1 %v404_v59  ;;  %v235_v1 = vpop.f32.mrb[7].mxu0  ;;  %v267_v2 = vpop.f32.mrb[7].mxu1  ;;  %v369_v8 = vadd.f32 %v771_v63, %v661_v54  ;;  %v982_v16 = vadd.f32 %v932_v26, %v368_v7  ;;  %v377_v32 = vadd.f32 %v779_v0, %v677_v24 }
 0x101   :  { %v367_v18 = vadd.f32 %v657_v6, %v235_v1  ;;  %v993_v21 = vadd.f32 %v932_v26, %v366_v12  ;;  %v375_v27 = vadd.f32 %v673_v15, %v267_v2  ;;  %v1003_v31 = vadd.f32 %v932_v26, %v374_v23 }
 0x102   :  { %v985_v17 = vadd.f32 %v932_v26, %v369_v8  ;;  %v407_v28 = vmul.f32 %v982_v16, %v982_v16  ;;  %v1013_v36 = vadd.f32 %v932_v26, %v376_v30  ;;  %v1016_v37 = vadd.f32 %v932_v26, %v377_v32 }
 0x103   :  { %v996_v25 = vadd.f32 %v932_v26, %v367_v18  ;;  %v1006_v33 = vadd.f32 %v932_v26, %v375_v27  ;;  %v405_v34 = vmul.f32 %v993_v21, %v993_v21  ;;  %v413_v38 = vmul.f32 %v1003_v31, %v1003_v31 }
 0x104   :  { %433 = vadd.xlane.f32.xlu0 %v409_v9  ;;  %439 = vadd.xlane.f32.xlu1 %v412_v10  ;;  %v408_v29 = vmul.f32 %v985_v17, %v985_v17  ;;  %v415_v42 = vmul.f32 %v1013_v36, %v1013_v36  ;;  %v416_v43 = vmul.f32 %v1016_v37, %v1016_v37 }
 0x105   :  { %v406_v35 = vmul.f32 %v996_v25, %v996_v25  ;;  %v414_v41 = vmul.f32 %v1006_v33, %v1006_v33 }
 0x108   :  { %435 = vadd.xlane.f32.xlu1 %v410_v14  ;;  %419 = vadd.xlane.f32.xlu0 %v402_v20 }
 0x10c   :  { %429 = vadd.xlane.f32.xlu0 %v407_v28  ;;  %431 = vadd.xlane.f32.xlu1 %v408_v29 }
 0x110   :  { %425 = vadd.xlane.f32.xlu0 %v405_v34  ;;  %427 = vadd.xlane.f32.xlu1 %v406_v35 }
 0x114   :  { %441 = vadd.xlane.f32.xlu0 %v413_v38  ;;  %443 = vadd.xlane.f32.xlu1 %v414_v41 }
 0x118   :  { %445 = vadd.xlane.f32.xlu0 %v415_v42  ;;  %447 = vadd.xlane.f32.xlu1 %v416_v43 }
 0x189   :  { %v438_v44 = vpop.xlane.xlu0 %437  ;;  %v422_v47 = vpop.xlane.xlu1 %421 }
 0x18a   :  { %v451_v26 = vmax.f32 %v422_v47, 1e-24  ;;  %v459_v48 = vmax.f32 %v438_v44, 1e-24 }
 0x18c   :  { %812 = vrsqrt.f32 %v451_v26 }
 0x18d   :  { %v418_v49 = vpop.xlane.xlu0 %417  ;;  %v424_v50 = vpop.xlane.xlu1 %423  ;;  %814 = vrsqrt.f32 %v459_v48 }
 0x18e   :  { %v452_v51 = vmax.f32 %v424_v50, 1e-24  ;;  %v449_v52 = vmax.f32 %v418_v49, 1e-24 }
 0x190   :  { %816 = vrsqrt.f32 %v452_v51 }
 0x191   :  { %v434_v53 = vpop.xlane.xlu0 %433  ;;  %v440_v54 = vpop.xlane.xlu1 %439  ;;  %818 = vrsqrt.f32 %v449_v52 }
 0x192   :  { %v457_v55 = vmax.f32 %v434_v53, 1e-24  ;;  %v460_v58 = vmax.f32 %v440_v54, 1e-24 }
 0x194   :  { %820 = vrsqrt.f32 %v457_v55 }
 0x195   :  { %822 = vrsqrt.f32 %v460_v58  ;;  %v436_v59 = vpop.xlane.xlu1 %435  ;;  %v420_v60 = vpop.xlane.xlu0 %419 }
 0x196   :  { %v458_v61 = vmax.f32 %v436_v59, 1e-24  ;;  %v450_v62 = vmax.f32 %v420_v60, 1e-24  ;;  %v813_v63 = vpop.eup %812 }
 0x197   :  { %v815_v2 = vpop.eup %814  ;;  %v483_v5 = vmul.f32 %v813_v63, %v938_v40 }
 0x198   :  { %824 = vrsqrt.f32 %v458_v61  ;;  %v491_v11 = vmul.f32 %v815_v2, %v935_v39 }
 0x199   :  { %826 = vrsqrt.f32 %v450_v62  ;;  %v430_v0 = vpop.xlane.xlu0 %429  ;;  %v432_v1 = vpop.xlane.xlu1 %431  ;;  %v499_v15 = vmax.f32 %v483_v5, 0.0 }
 0x19a   :  { %v455_v6 = vmax.f32 %v430_v0, 1e-24  ;;  %v456_v7 = vmax.f32 %v432_v1, 1e-24  ;;  %v817_v8 = vpop.eup %816  ;;  %v507_v24 = vmax.f32 %v491_v11, 0.0 }
 0x19b   :  { %v484_v9 = vmul.f32 %v817_v8, %v944_v46  ;;  %v819_v10 = vpop.eup %818 }
 0x19c   :  { %828 = vrsqrt.f32 %v455_v6  ;;  %v481_v29 = vmul.f32 %v819_v10, %v941_v45 }
 0x19d   :  { %830 = vrsqrt.f32 %v456_v7  ;;  %v426_v12 = vpop.xlane.xlu0 %425  ;;  %v428_v13 = vpop.xlane.xlu1 %427  ;;  %v500_v18 = vmax.f32 %v484_v9, 0.0 }
 0x19e   :  { %v821_v14 = vpop.eup %820  ;;  %v453_v19 = vmax.f32 %v426_v12, 1e-24  ;;  %v454_v20 = vmax.f32 %v428_v13, 1e-24  ;;  %v497_v47 = vmax.f32 %v481_v29, 0.0 }
 0x19f   :  { %v823_v22 = vpop.eup %822  ;;  %v686_v23 = vpack.c.bf16 %v500_v18, %v499_v15  ;;  %v489_v46 = vmul.f32 %v821_v14, %v954_v56 }
 0x1a0   :  { %v492_v40 = vmul.f32 %v823_v22, %v957_v57  ;;  %832 = vrsqrt.f32 %v453_v19 }
 0x1a1   :  { %834 = vrsqrt.f32 %v454_v20  ;;  %v442_v27 = vpop.xlane.xlu0 %441  ;;  %v444_v28 = vpop.xlane.xlu1 %443  ;;  %725 = vst [vmem:[%s1070_s4 + $0x8] sm:$0xff] %v686_v23   ;;  %v505_v56 = vmax.f32 %v489_v46, 0.0 }
 0x1a2   :  { %v825_v39 = vpop.eup %824  ;;  %v508_v30 = vmax.f32 %v492_v40, 0.0  ;;  %v461_v32 = vmax.f32 %v442_v27, 1e-24  ;;  %v462_v34 = vmax.f32 %v444_v28, 1e-24 }
 0x1a3   :  { %v827_v35 = vpop.eup %826  ;;  %v490_v57 = vmul.f32 %v825_v39, %v970_v4 }
 0x1a4   :  { %v706_v38 = vpack.c.bf16 %v508_v30, %v507_v24  ;;  %v482_v41 = vmul.f32 %v827_v35, %v967_v3  ;;  %836 = vrsqrt.f32 %v461_v32 }
 0x1a5   :  { %v506_v42 = vmax.f32 %v490_v57, 0.0  ;;  %838 = vrsqrt.f32 %v462_v34  ;;  %v446_v43 = vpop.xlane.xlu0 %445  ;;  %v448_v44 = vpop.xlane.xlu1 %447 }
 0x1a6   :  { %v829_v45 = vpop.eup %828  ;;  %729 = vst [vmem:[%s1070_s4 + $0x28] sm:$0xff] %v706_v38   ;;  %v498_v26 = vmax.f32 %v482_v41, 0.0  ;;  %v463_v48 = vmax.f32 %v446_v43, 1e-24  ;;  %v464_v49 = vmax.f32 %v448_v44, 1e-24 }
 0x1a7   :  { %v831_v50 = vpop.eup %830  ;;  %v701_v4 = vpack.c.bf16 %v506_v42, %v505_v56  ;;  %v487_v51 = vmul.f32 %v829_v45, %v982_v16 }
 0x1a8   :  { %v681_v3 = vpack.c.bf16 %v498_v26, %v497_v47  ;;  %v488_v52 = vmul.f32 %v831_v50, %v985_v17  ;;  %840 = vrsqrt.f32 %v463_v48 }
 0x1a9   :  { %728 = vst [vmem:[%s1070_s4 + $0x20] sm:$0xff] %v701_v4   ;;  %v503_v53 = vmax.f32 %v487_v51, 0.0  ;;  %842 = vrsqrt.f32 %v464_v49 }
 0x1aa   :  { %v833_v54 = vpop.eup %832  ;;  %682 = vst [vmem:[%s1070_s4] sm:$0xff] %v681_v3   ;;  %v504_v55 = vmax.f32 %v488_v52, 0.0 }
 0x1ab   :  { %v835_v58 = vpop.eup %834  ;;  %v485_v59 = vmul.f32 %v833_v54, %v993_v21 }
 0x1ac   :  { %v696_v16 = vpack.c.bf16 %v504_v55, %v503_v53  ;;  %v486_v60 = vmul.f32 %v835_v58, %v996_v25 }
 0x1ad   :  { %v501_v17 = vmax.f32 %v485_v59, 0.0 }
 0x1ae   :  { %v837_v61 = vpop.eup %836  ;;  %727 = vst [vmem:[%s1070_s4 + $0x18] sm:$0xff] %v696_v16   ;;  %v502_v62 = vmax.f32 %v486_v60, 0.0 }
 0x1af   :  { %v839_v63 = vpop.eup %838  ;;  %v493_v0 = vmul.f32 %v837_v61, %v1003_v31 }
 0x1b0   :  { %v691_v1 = vpack.c.bf16 %v502_v62, %v501_v17  ;;  %v494_v2 = vmul.f32 %v839_v63, %v1006_v33 }
 0x1b1   :  { %v509_v5 = vmax.f32 %v493_v0, 0.0 }
 0x1b2   :  { %v841_v6 = vpop.eup %840  ;;  %726 = vst [vmem:[%s1070_s4 + $0x10] sm:$0xff] %v691_v1   ;;  %v510_v21 = vmax.f32 %v494_v2, 0.0 }
 0x1b3   :  { %v843_v25 = vpop.eup %842  ;;  %v495_v7 = vmul.f32 %v841_v6, %v1013_v36 }
 0x1b4   :  { %v711_v8 = vpack.c.bf16 %v510_v21, %v509_v5  ;;  %v496_v9 = vmul.f32 %v843_v25, %v1016_v37 }
 0x1b5   :  { %v511_v10 = vmax.f32 %v495_v7, 0.0 }
 0x1b6   :  { %730 = vst [vmem:[%s1070_s4 + $0x30] sm:$0xff] %v711_v8   ;;  %v512_v31 = vmax.f32 %v496_v9, 0.0 }
 0x1b8   :  { %v716_v33 = vpack.c.bf16 %v512_v31, %v511_v10 }
 0x1ba   :  { %731 = vst [vmem:[%s1070_s4 + $0x38] sm:$0xff] %v716_v33  }

// kernel: nodegsage_forward.13
= control target key start
LH: loop header
LB: loop body
LE: loop exit
PB: predicated region body
PF: predicated region fallthrough
CT: control target
= control target key end

     0   :  { %s1078_s3 = inlined_call_operand.vmem [shape: bf16[384,128], index: 3, kind: input, shape index: {}]   ;;  %s1079_s1 = inlined_call_operand.vmem [shape: bf16[128,128], index: 1, kind: input, shape index: {}]   ;;  %s1080_s0 = inlined_call_operand.vmem [shape: bf16[128,128], index: 0, kind: input, shape index: {}]   ;;  %s1081_s2 = inlined_call_operand.vmem [shape: bf16[128,128], index: 2, kind: input, shape index: {}]   ;;  %s1082_s4 = inlined_call_operand.vmem [shape: f32[1,128], index: 4, kind: input, shape index: {}]   ;;  %s1083_s5 = inlined_call_operand.vmem [shape: f32[128,128], index: 5, kind: output, shape index: {}]  }
   0x1   :  { %v787_v0 = vld [vmem:[%s1078_s3 + $0x40] sm:$0xff]   ;;  %v789_v2 = vld [vmem:[%s1078_s3 + $0x48] sm:$0xff]   ;;  %v792_v5 = vld [vmem:[%s1078_s3 + $0x50] sm:$0xff]  }
   0x2   :  { %v788_v1 = vld [vmem:[%s1078_s3] sm:$0xff]   ;;  %675 = vmatprep.subr.bf16.mxu0 %v787_v0  ;;  %v791_v4 = vld [vmem:[%s1078_s3 + $0x8] sm:$0xff]   ;;  %v794_v7 = vld [vmem:[%s1078_s3 + $0x10] sm:$0xff]  }
   0x3   :  { %676 = vmatpush3.bf16.msra.mxu0 %v788_v1  ;;  %v790_v3 = vld [vmem:[%s1078_s3 + $0x80] sm:$0xff]   ;;  %v793_v6 = vld [vmem:[%s1078_s3 + $0x88] sm:$0xff]   ;;  %v795_v8 = vld [vmem:[%s1078_s3 + $0x58] sm:$0xff]  }
   0x4   :  { %677 = vmatprep.subr.bf16.mxu0 %v789_v2  ;;  %755 = vmatprep.subr.bf16.mxu1 %v790_v3  ;;  %v796_v9 = vld [vmem:[%s1078_s3 + $0x90] sm:$0xff]   ;;  %v797_v10 = vld [vmem:[%s1078_s3 + $0x18] sm:$0xff]   ;;  %v798_v11 = vld [vmem:[%s1078_s3 + $0x60] sm:$0xff]  }
   0x5   :  { %756 = vmatpush3.bf16.msra.mxu1 %v790_v3  ;;  %v799_v12 = vld [vmem:[%s1078_s3 + $0x98] sm:$0xff]   ;;  %v800_v13 = vld [vmem:[%s1078_s3 + $0x20] sm:$0xff]   ;;  %v801_v15 = vld [vmem:[%s1078_s3 + $0x68] sm:$0xff]  }
   0x6   :  { %757 = vmatprep.subr.bf16.mxu1 %v793_v6  ;;  %v802_v14 = vld [vmem:[%s1078_s3 + $0xa0] sm:$0xff]   ;;  %v803_v16 = vld [vmem:[%s1078_s3 + $0x28] sm:$0xff]   ;;  %v804_v18 = vld [vmem:[%s1078_s3 + $0x70] sm:$0xff]  }
   0x7   :  { %678 = vmatpush3.bf16.msra.mxu0 %v791_v4  ;;  %v805_v17 = vld [vmem:[%s1078_s3 + $0xa8] sm:$0xff]   ;;  %v806_v19 = vld [vmem:[%s1078_s3 + $0x30] sm:$0xff]   ;;  %v810_v21 = vld [vmem:[%s1079_s1] sm:$0xff]  }
   0x8   :  { %679 = vmatprep.subr.bf16.mxu0 %v792_v5  ;;  %v808_v20 = vld [vmem:[%s1078_s3 + $0xb0] sm:$0xff]   ;;  %v807_v22 = vld [vmem:[%s1078_s3 + $0x78] sm:$0xff]   ;;  %444 = vmatprep.mubr.bf16.mxu0 %v810_v21  ;;  %v813_v24 = vld [vmem:[%s1081_s2] sm:$0xff]  }
   0x9   :  { %758 = vmatpush3.bf16.msra.mxu1 %v793_v6  ;;  %v809_v23 = vld [vmem:[%s1078_s3 + $0x38] sm:$0xff]   ;;  %771 = vmatprep.mubr.bf16.mxu1 %v813_v24  ;;  %v811_v26 = vld [vmem:[%s1080_s0] sm:$0xff]   ;;  %v815_v27 = vld [vmem:[%s1079_s1 + $0x8] sm:$0xff]  }
   0xa   :  { %759 = vmatprep.subr.bf16.mxu1 %v796_v9  ;;  %v812_v25 = vld [vmem:[%s1078_s3 + $0xb8] sm:$0xff]   ;;  %v814_v28 = vld [vmem:[%s1081_s2 + $0x8] sm:$0xff]   ;;  %v819_v29 = vld [vmem:[%s1081_s2 + $0x10] sm:$0xff]  }
   0xb   :  { %680 = vmatpush3.bf16.msra.mxu0 %v794_v7  ;;  %v816_v30 = vld [vmem:[%s1080_s0 + $0x8] sm:$0xff]   ;;  %v817_v31 = vld [vmem:[%s1079_s1 + $0x10] sm:$0xff]   ;;  %v820_v32 = vld [vmem:[%s1081_s2 + $0x18] sm:$0xff]  }
   0xc   :  { %681 = vmatprep.subr.bf16.mxu0 %v795_v8  ;;  %v825_v33 = vld [vmem:[%s1081_s2 + $0x20] sm:$0xff]   ;;  %v818_v34 = vld [vmem:[%s1080_s0 + $0x10] sm:$0xff]   ;;  %v821_v35 = vld [vmem:[%s1079_s1 + $0x18] sm:$0xff]  }
   0xd   :  { %760 = vmatpush3.bf16.msra.mxu1 %v796_v9  ;;  %v826_v36 = vld [vmem:[%s1081_s2 + $0x28] sm:$0xff]   ;;  %v831_v37 = vld [vmem:[%s1081_s2 + $0x30] sm:$0xff]   ;;  %v822_v38 = vld [vmem:[%s1080_s0 + $0x18] sm:$0xff]  }
   0xe   :  { %761 = vmatprep.subr.bf16.mxu1 %v799_v12  ;;  %v823_v39 = vld [vmem:[%s1079_s1 + $0x20] sm:$0xff]   ;;  %v832_v40 = vld [vmem:[%s1081_s2 + $0x38] sm:$0xff]   ;;  %v827_v42 = vld [vmem:[%s1079_s1 + $0x28] sm:$0xff]  }
   0xf   :  { %682 = vmatpush3.bf16.msra.mxu0 %v797_v10  ;;  %v824_v41 = vld [vmem:[%s1080_s0 + $0x20] sm:$0xff]   ;;  %v828_v43 = vld [vmem:[%s1080_s0 + $0x28] sm:$0xff]   ;;  %v829_v44 = vld [vmem:[%s1079_s1 + $0x30] sm:$0xff]  }
  0x10   :  { %683 = vmatprep.subr.bf16.mxu0 %v798_v11  ;;  %v830_v45 = vld [vmem:[%s1080_s0 + $0x30] sm:$0xff]   ;;  %v833_v46 = vld [vmem:[%s1079_s1 + $0x38] sm:$0xff]   ;;  %v1012_v50 = vld [vmem:[%s1082_s4] ss:$0 sm:$0xff] }
  0x11   :  { %762 = vmatpush3.bf16.msra.mxu1 %v799_v12  ;;  %v834_v47 = vld [vmem:[%s1080_s0 + $0x38] sm:$0xff]  }
  0x12   :  { %763 = vmatprep.subr.bf16.mxu1 %v802_v14 }
  0x13   :  { %684 = vmatpush3.bf16.msra.mxu0 %v800_v13 }
  0x14   :  { %685 = vmatprep.subr.bf16.mxu0 %v801_v15 }
  0x15   :  { %764 = vmatpush3.bf16.msra.mxu1 %v802_v14 }
  0x16   :  { %765 = vmatprep.subr.bf16.mxu1 %v805_v17 }
  0x17   :  { %686 = vmatpush3.bf16.msra.mxu0 %v803_v16 }
  0x18   :  { %687 = vmatprep.subr.bf16.mxu0 %v804_v18 }
  0x19   :  { %766 = vmatpush3.bf16.msra.mxu1 %v805_v17 }
  0x1a   :  { %767 = vmatprep.subr.bf16.mxu1 %v808_v20 }
  0x1b   :  { %688 = vmatpush3.bf16.msra.mxu0 %v806_v19 }
  0x1c   :  { %689 = vmatprep.subr.bf16.mxu0 %v807_v22 }
  0x1d   :  { %768 = vmatpush3.bf16.msra.mxu1 %v808_v20 }
  0x1e   :  { %769 = vmatprep.subr.bf16.mxu1 %v812_v25 }
  0x1f   :  { %690 = vmatpush3.bf16.msra.mxu0 %v809_v23 }
  0x21   :  { %770 = vmatpush3.bf16.msra.mxu1 %v812_v25 }
  0x22   :  { %445 = vmatmul.mubr.bf16.vlgmr.msra.gmra.mrb[0].mxu0 %v811_v26 }
  0x23   :  { %452 = vmatprep.mubr.bf16.mxu0 %v815_v27 }
  0x24   :  { %772 = vmatmul.mubr.bf16.vlgmr.msra.gmra.mrb[0].mxu1 %v814_v28 }
  0x25   :  { %775 = vmatprep.mubr.bf16.mxu1 %v819_v29 }
  0x2a   :  { %453 = vmatmul.mubr.bf16.gmra.mrb[4].mxu0 %v816_v30 }
  0x2b   :  { %460 = vmatprep.mubr.bf16.mxu0 %v817_v31 }
  0x2c   :  { %776 = vmatmul.mubr.bf16.gmra.mrb[4].mxu1 %v820_v32 }
  0x2d   :  { %779 = vmatprep.mubr.bf16.mxu1 %v825_v33 }
  0x32   :  { %461 = vmatmul.mubr.bf16.gmra.mrb[8].mxu0 %v818_v34 }
  0x33   :  { %468 = vmatprep.mubr.bf16.mxu0 %v821_v35 }
  0x34   :  { %780 = vmatmul.mubr.bf16.gmra.mrb[8].mxu1 %v826_v36 }
  0x35   :  { %783 = vmatprep.mubr.bf16.mxu1 %v831_v37 }
  0x3a   :  { %469 = vmatmul.mubr.bf16.gmra.mrb[12].mxu0 %v822_v38 }
  0x3b   :  { %476 = vmatprep.mubr.bf16.mxu0 %v823_v39 }
  0x3c   :  { %784 = vmatmul.mubr.bf16.gmra.mrb[12].mxu1 %v832_v40 }
  0x42   :  { %477 = vmatmul.mubr.bf16.gmra.mrb[16].mxu0 %v824_v41 }
  0x43   :  { %484 = vmatprep.mubr.bf16.mxu0 %v827_v42 }
  0x4a   :  { %485 = vmatmul.mubr.bf16.gmra.mrb[20].mxu0 %v828_v43 }
  0x4b   :  { %492 = vmatprep.mubr.bf16.mxu0 %v829_v44 }
  0x52   :  { %493 = vmatmul.mubr.bf16.gmra.mrb[24].mxu0 %v830_v45 }
  0x53   :  { %500 = vmatprep.mubr.bf16.mxu0 %v833_v46 }
  0x5a   :  { %501 = vmatmul.mubr.bf16.gmra.mrb[28].mxu0 %v834_v47 }
  0xf5   :  { %v691_v48 = vpop.f32.mrb[0].mxu0 }
  0xf6   :  { %v692_v49 = vpop.f32.mrb[1].mxu0 }
  0xf7   :  { %v693_v51 = vadd.f32 %v692_v49, %v691_v48  ;;  %v694_v52 = vpop.f32.mrb[2].mxu0  ;;  %v773_v54 = vpop.f32.mrb[0].mxu1 }
  0xf8   :  { %v695_v53 = vpop.f32.mrb[3].mxu0  ;;  %v543_v57 = vpop.f32.mrb[1].mxu1 }
  0xf9   :  { %v696_v55 = vadd.f32 %v695_v53, %v694_v52  ;;  %v447_v56 = vadd.f32 %v693_v51, %v1012_v50  ;;  %v774_v58 = vpop.f32.mrb[2].mxu1 }
  0xfa   :  { %v546_v61 = vpop.f32.mrb[3].mxu1 }
  0xfb   :  { %v544_v59 = vadd.f32 %v543_v57, %v447_v56  ;;  %v450_v60 = vadd.f32 %v696_v55, %v1012_v50 }
  0xfd   :  { %606 = vst [vmem:[%s1083_s5] sm:$0xff] %v544_v59  ;;  %v547_v62 = vadd.f32 %v546_v61, %v450_v60  ;;  %v697_v63 = vpop.f32.mrb[4].mxu0 }
  0xfe   :  { %v698_v0 = vpop.f32.mrb[5].mxu0 }
  0xff   :  { %607 = vst [vmem:[%s1083_s5 + $0x8] sm:$0xff] %v547_v62  ;;  %v699_v1 = vadd.f32 %v698_v0, %v697_v63  ;;  %v700_v2 = vpop.f32.mrb[6].mxu0  ;;  %v777_v4 = vpop.f32.mrb[4].mxu1 }
 0x100   :  { %v701_v3 = vpop.f32.mrb[7].mxu0  ;;  %v559_v7 = vpop.f32.mrb[5].mxu1 }
 0x101   :  { %v455_v5 = vadd.f32 %v699_v1, %v1012_v50  ;;  %v702_v6 = vadd.f32 %v701_v3, %v700_v2  ;;  %v778_v8 = vpop.f32.mrb[6].mxu1 }
 0x102   :  { %v562_v11 = vpop.f32.mrb[7].mxu1 }
 0x103   :  { %v552_v9 = vadd.f32 %v773_v54, %v455_v5  ;;  %v458_v10 = vadd.f32 %v702_v6, %v1012_v50 }
 0x105   :  { %608 = vst [vmem:[%s1083_s5 + $0x10] sm:$0xff] %v552_v9  ;;  %v555_v12 = vadd.f32 %v774_v58, %v458_v10  ;;  %v703_v13 = vpop.f32.mrb[8].mxu0 }
 0x106   :  { %v704_v14 = vpop.f32.mrb[9].mxu0 }
 0x107   :  { %609 = vst [vmem:[%s1083_s5 + $0x18] sm:$0xff] %v555_v12  ;;  %v705_v15 = vadd.f32 %v704_v14, %v703_v13  ;;  %v706_v16 = vpop.f32.mrb[10].mxu0  ;;  %v781_v18 = vpop.f32.mrb[8].mxu1 }
 0x108   :  { %v707_v17 = vpop.f32.mrb[11].mxu0  ;;  %v575_v21 = vpop.f32.mrb[9].mxu1 }
 0x109   :  { %v708_v19 = vadd.f32 %v707_v17, %v706_v16  ;;  %v463_v20 = vadd.f32 %v705_v15, %v1012_v50  ;;  %v782_v22 = vpop.f32.mrb[10].mxu1 }
 0x10a   :  { %v578_v25 = vpop.f32.mrb[11].mxu1 }
 0x10b   :  { %v560_v23 = vadd.f32 %v559_v7, %v463_v20  ;;  %v466_v24 = vadd.f32 %v708_v19, %v1012_v50 }
 0x10d   :  { %610 = vst [vmem:[%s1083_s5 + $0x20] sm:$0xff] %v560_v23  ;;  %v563_v26 = vadd.f32 %v562_v11, %v466_v24  ;;  %v709_v27 = vpop.f32.mrb[12].mxu0 }
 0x10e   :  { %v710_v28 = vpop.f32.mrb[13].mxu0 }
 0x10f   :  { %611 = vst [vmem:[%s1083_s5 + $0x28] sm:$0xff] %v563_v26  ;;  %v711_v29 = vadd.f32 %v710_v28, %v709_v27  ;;  %v712_v30 = vpop.f32.mrb[14].mxu0  ;;  %v785_v32 = vpop.f32.mrb[12].mxu1 }
 0x110   :  { %v713_v31 = vpop.f32.mrb[15].mxu0  ;;  %v591_v35 = vpop.f32.mrb[13].mxu1 }
 0x111   :  { %v471_v33 = vadd.f32 %v711_v29, %v1012_v50  ;;  %v714_v34 = vadd.f32 %v713_v31, %v712_v30  ;;  %v786_v36 = vpop.f32.mrb[14].mxu1 }
 0x112   :  { %v594_v39 = vpop.f32.mrb[15].mxu1 }
 0x113   :  { %v568_v37 = vadd.f32 %v777_v4, %v471_v33  ;;  %v474_v38 = vadd.f32 %v714_v34, %v1012_v50 }
 0x115   :  { %612 = vst [vmem:[%s1083_s5 + $0x30] sm:$0xff] %v568_v37  ;;  %v571_v40 = vadd.f32 %v778_v8, %v474_v38  ;;  %v715_v41 = vpop.f32.mrb[16].mxu0 }
 0x116   :  { %v716_v42 = vpop.f32.mrb[17].mxu0 }
 0x117   :  { %613 = vst [vmem:[%s1083_s5 + $0x38] sm:$0xff] %v571_v40  ;;  %v717_v43 = vadd.f32 %v716_v42, %v715_v41  ;;  %v718_v44 = vpop.f32.mrb[18].mxu0 }
 0x118   :  { %v719_v45 = vpop.f32.mrb[19].mxu0 }
 0x119   :  { %v720_v46 = vadd.f32 %v719_v45, %v718_v44  ;;  %v479_v47 = vadd.f32 %v717_v43, %v1012_v50 }
 0x11b   :  { %v576_v48 = vadd.f32 %v575_v21, %v479_v47  ;;  %v482_v49 = vadd.f32 %v720_v46, %v1012_v50 }
 0x11d   :  { %614 = vst [vmem:[%s1083_s5 + $0x40] sm:$0xff] %v576_v48  ;;  %v579_v51 = vadd.f32 %v578_v25, %v482_v49  ;;  %v721_v52 = vpop.f32.mrb[20].mxu0 }
 0x11e   :  { %v722_v53 = vpop.f32.mrb[21].mxu0 }
 0x11f   :  { %615 = vst [vmem:[%s1083_s5 + $0x48] sm:$0xff] %v579_v51  ;;  %v723_v54 = vadd.f32 %v722_v53, %v721_v52  ;;  %v724_v55 = vpop.f32.mrb[22].mxu0 }
 0x120   :  { %v725_v56 = vpop.f32.mrb[23].mxu0 }
 0x121   :  { %v487_v57 = vadd.f32 %v723_v54, %v1012_v50  ;;  %v726_v58 = vadd.f32 %v725_v56, %v724_v55 }
 0x123   :  { %v584_v59 = vadd.f32 %v781_v18, %v487_v57  ;;  %v490_v60 = vadd.f32 %v726_v58, %v1012_v50 }
 0x125   :  { %616 = vst [vmem:[%s1083_s5 + $0x50] sm:$0xff] %v584_v59  ;;  %v587_v61 = vadd.f32 %v782_v22, %v490_v60  ;;  %v727_v62 = vpop.f32.mrb[24].mxu0 }
 0x126   :  { %v728_v63 = vpop.f32.mrb[25].mxu0 }
 0x127   :  { %617 = vst [vmem:[%s1083_s5 + $0x58] sm:$0xff] %v587_v61  ;;  %v729_v0 = vadd.f32 %v728_v63, %v727_v62  ;;  %v730_v1 = vpop.f32.mrb[26].mxu0 }
 0x128   :  { %v731_v2 = vpop.f32.mrb[27].mxu0 }
 0x129   :  { %v732_v3 = vadd.f32 %v731_v2, %v730_v1  ;;  %v495_v4 = vadd.f32 %v729_v0, %v1012_v50 }
 0x12b   :  { %v592_v5 = vadd.f32 %v591_v35, %v495_v4  ;;  %v498_v6 = vadd.f32 %v732_v3, %v1012_v50 }
 0x12d   :  { %618 = vst [vmem:[%s1083_s5 + $0x60] sm:$0xff] %v592_v5  ;;  %v595_v7 = vadd.f32 %v594_v39, %v498_v6  ;;  %v733_v8 = vpop.f32.mrb[28].mxu0 }
 0x12e   :  { %v734_v9 = vpop.f32.mrb[29].mxu0 }
 0x12f   :  { %619 = vst [vmem:[%s1083_s5 + $0x68] sm:$0xff] %v595_v7  ;;  %v735_v10 = vadd.f32 %v734_v9, %v733_v8  ;;  %v736_v11 = vpop.f32.mrb[30].mxu0 }
 0x130   :  { %v737_v12 = vpop.f32.mrb[31].mxu0 }
 0x131   :  { %v503_v13 = vadd.f32 %v735_v10, %v1012_v50  ;;  %v738_v14 = vadd.f32 %v737_v12, %v736_v11 }
 0x133   :  { %v600_v15 = vadd.f32 %v785_v32, %v503_v13  ;;  %v506_v16 = vadd.f32 %v738_v14, %v1012_v50 }
 0x135   :  { %620 = vst [vmem:[%s1083_s5 + $0x70] sm:$0xff] %v600_v15  ;;  %v603_v17 = vadd.f32 %v786_v36, %v506_v16 }
 0x137   :  { %621 = vst [vmem:[%s1083_s5 + $0x78] sm:$0xff] %v603_v17 }

</bundles_post_ra>
